<compile_context>
chip_gen: v7x
topology: tpu7x:2x2x1
jax: 0.10.0
libtpu: 0.0.40
codegen_flags: <defaults>
</compile_context>

<pallas_src>
import functools

import jax
import jax.numpy as jnp
from jax.experimental import pallas as pl
from jax.experimental.pallas import tpu as pltpu

_LANE = 128                       # lane width (last-dim tile granule)
_SUBLANE = 32                     # row-block granule: covers f32/bf16/int8 packing
_TARGET_STEP_BYTES = 16 * 1024 * 1024   # target input bytes per grid step
_VMEM_HEADROOM = 8 * 1024 * 1024        # leave room for the compiler


def _round_up(x: int, m: int) -> int:
    return (x + m - 1) // m * m


def _vmem_capacity_bytes() -> int:
    try:
        info = pltpu.get_tpu_info()
        cap = int(getattr(info, "vmem_capacity_bytes", 0))
        if cap > 0:
            return cap
    except Exception:
        pass
    return 64 * 1024 * 1024       # v7x per-TC size == safe lower bound


# ---------------------------------------------------------------------------
# Kernel helpers
# ---------------------------------------------------------------------------


def _tile_loss(lp_ref, olp_ref, adv_ref, clip_eps):
    """Elementwise PPO clipped-surrogate loss for the current (tb, ts) tile."""
    lp = lp_ref[...].astype(jnp.float32)
    olp = olp_ref[...].astype(jnp.float32)
    adv = adv_ref[...].astype(jnp.float32)

    ratio = jnp.exp(lp - olp)                                   # EUP
    surr1 = ratio * adv                                         # VPU
    surr2 = jnp.clip(ratio, 1.0 - clip_eps, 1.0 + clip_eps) * adv
    return -jnp.minimum(surr1, surr2)


def _col_valid(block_s, seq_len):
    """(1, block_s) bool mask of globally-valid columns for the current tile."""
    s = pl.program_id(1)
    col = jax.lax.broadcasted_iota(jnp.int32, (1, block_s), 1) + s * block_s
    return col < seq_len


def _fold_lane_groups(x):
    """(tb, ts) -> (tb, 128): fold the ts/128 lane groups with pure VPU adds."""
    ts = x.shape[-1]
    acc = x[:, :_LANE]
    for j in range(1, ts // _LANE):
        acc = acc + x[:, j * _LANE:(j + 1) * _LANE]
    return acc


# ---------------------------------------------------------------------------
# Kernels
# ---------------------------------------------------------------------------


def _policy_loss_masked_kernel(lp_ref, olp_ref, adv_ref, mask_ref, out_ref,
                               num_sc, den_sc, *, clip_eps, seq_len, ragged_s):
    s = pl.program_id(1)

    @pl.when(s == 0)
    def _init():
        num_sc[...] = jnp.zeros_like(num_sc)
        den_sc[...] = jnp.zeros_like(den_sc)

    loss = _tile_loss(lp_ref, olp_ref, adv_ref, clip_eps)
    m = mask_ref[...].astype(jnp.float32)
    num_t = loss * m
    den_t = m
    if ragged_s:
        valid = _col_valid(lp_ref.shape[-1], seq_len)
        num_t = jnp.where(valid, num_t, 0.0)     # where(): OOB garbage can't leak
        den_t = jnp.where(valid, den_t, 0.0)

    # Lane-dense accumulate (VPU only); cross-lane reduce deferred to finalize.
    num_sc[...] += _fold_lane_groups(num_t)
    den_sc[...] += _fold_lane_groups(den_t)

    @pl.when(s == pl.num_programs(1) - 1)
    def _finalize():
        num = jnp.sum(num_sc[...], axis=-1, keepdims=True)      # one XLU reduce
        den = jnp.sum(den_sc[...], axis=-1, keepdims=True)
        out_ref[...] = num / den


def _policy_loss_nomask_kernel(lp_ref, olp_ref, adv_ref, out_ref, num_sc,
                               *, clip_eps, seq_len, inv_len, ragged_s):
    s = pl.program_id(1)

    @pl.when(s == 0)
    def _init():
        num_sc[...] = jnp.zeros_like(num_sc)

    loss = _tile_loss(lp_ref, olp_ref, adv_ref, clip_eps)
    if ragged_s:
        loss = jnp.where(_col_valid(lp_ref.shape[-1], seq_len), loss, 0.0)

    num_sc[...] += _fold_lane_groups(loss)

    @pl.when(s == pl.num_programs(1) - 1)
    def _finalize():
        out_ref[...] = jnp.sum(num_sc[...], axis=-1, keepdims=True) * inv_len


# ---------------------------------------------------------------------------
# Pure-JAX reference (also the tiny-shape fast path)
# ---------------------------------------------------------------------------


def _policy_loss_ref(log_probs, old_log_probs, advantages, action_mask=None,
                     clip_eps=0.2):
    lp = jnp.asarray(log_probs, jnp.float32)
    olp = jnp.asarray(old_log_probs, jnp.float32)
    adv = jnp.asarray(advantages, jnp.float32)
    ratio = jnp.exp(lp - olp)
    surr1 = ratio * adv
    surr2 = jnp.clip(ratio, 1.0 - clip_eps, 1.0 + clip_eps) * adv
    loss = -jnp.minimum(surr1, surr2)
    if action_mask is None:
        per_row = jnp.mean(loss, axis=-1)
    else:
        m = jnp.asarray(action_mask, jnp.float32)
        per_row = jnp.sum(loss * m, axis=-1) / jnp.sum(m, axis=-1)
    return jnp.mean(per_row)


# ---------------------------------------------------------------------------
# Wrapper
# ---------------------------------------------------------------------------


def policy_loss(log_probs, old_log_probs, advantages, action_mask=None,
                clip_eps=0.2, *, block_b=None, block_s=None, use_pallas=None):
    """Pallas-backed equivalent of PolicyLoss.forward. Returns a scalar.

    Note: a row whose action_mask sums to zero yields 0/0 -> NaN, matching the
    reference masked-mean semantics of the PyTorch module.
    """
    log_probs = jnp.asarray(log_probs)
    old_log_probs = jnp.asarray(old_log_probs)
    advantages = jnp.asarray(advantages)
    B, S = log_probs.shape

    masked = action_mask is not None
    if masked:
        action_mask = jnp.asarray(action_mask)
        if action_mask.dtype == jnp.bool_:
            # TODO(synk): pass bool straight through once i1 operand lowering
            # is verified; int8 conversion is a cheap 1B->1B copy for now.
            action_mask = action_mask.astype(jnp.int8)
        elif action_mask.dtype.itemsize > 4:
            action_mask = action_mask.astype(jnp.float32)
        # <=4-byte int/float masks are DMA'd as-is (no extra HBM copy).

    # Tiny problems: a pallas_call launch is pure overhead, let XLA fuse it.
    if use_pallas is None:
        use_pallas = (B * S) >= (64 * 1024)
    if not use_pallas:
        return _policy_loss_ref(log_probs, old_log_probs, advantages,
                                action_mask if masked else None, clip_eps)

    inputs = [log_probs, old_log_probs, advantages]
    if masked:
        inputs.append(action_mask)
    bytes_per_elem = sum(x.dtype.itemsize for x in inputs)
    n_scratch = 2 if masked else 1

    capacity = _vmem_capacity_bytes()
    budget = max(8 << 20, capacity - _VMEM_HEADROOM)

    # Row tile: >= 2 blocks once B >= 64 so both v7x TensorCores get work.
    if block_b is None:
        if B >= 64:
            block_b = min(256, _round_up((B + 1) // 2, _SUBLANE))
        else:
            block_b = _SUBLANE
    else:
        block_b = _round_up(max(int(block_b), 1), _SUBLANE)
    block_b = max(_SUBLANE, min(block_b, _round_up(B, _SUBLANE)))

    # Column tile: target ~16 MiB of input bytes per grid step (dtype-aware).
    max_block_s = max(_LANE, _round_up(S, _LANE))
    if block_s is None:
        bs = _TARGET_STEP_BYTES // max(1, block_b * bytes_per_elem)
        block_s = max(_LANE, (bs // _LANE) * _LANE)
    else:
        block_s = _round_up(max(int(block_s), 1), _LANE)
    block_s = min(block_s, max_block_s)

    # Clamp to the double-buffered per-core VMEM budget (shrink S tile first).
    def _vmem_need(bb, bs):
        return (2 * bb * bs * bytes_per_elem            # double-buffered inputs
                + n_scratch * bb * _LANE * 4            # accumulators
                + (2 << 20))                            # output blocks / slack

    while block_s > _LANE and _vmem_need(block_b, block_s) > budget:
        block_s = max(_LANE, ((block_s // 2) // _LANE) * _LANE)
    while block_b > _SUBLANE and _vmem_need(block_b, block_s) > budget:
        block_b = max(_SUBLANE, _round_up(block_b // 2, _SUBLANE))

    grid = (pl.cdiv(B, block_b), pl.cdiv(S, block_s))
    ragged_s = (S % block_s) != 0

    in_specs = [pl.BlockSpec((block_b, block_s), lambda b, s: (b, s))
                for _ in inputs]
    out_spec = pl.BlockSpec((block_b, 1), lambda b, s: (b, 0))

    if masked:
        kernel = functools.partial(_policy_loss_masked_kernel,
                                   clip_eps=float(clip_eps), seq_len=S,
                                   ragged_s=ragged_s)
        scratch = [pltpu.VMEM((block_b, _LANE), jnp.float32),
                   pltpu.VMEM((block_b, _LANE), jnp.float32)]
    else:
        kernel = functools.partial(_policy_loss_nomask_kernel,
                                   clip_eps=float(clip_eps), seq_len=S,
                                   inv_len=1.0 / float(S), ragged_s=ragged_s)
        scratch = [pltpu.VMEM((block_b, _LANE), jnp.float32)]

    vmem_limit = int(min(budget,
                         max(32 << 20, _vmem_need(block_b, block_s) + (2 << 20))))

    cost = pl.CostEstimate(
        flops=7 * B * S,
        transcendentals=B * S,
        bytes_accessed=sum(x.nbytes for x in inputs) + B * 4,
    )

    per_row = pl.pallas_call(
        kernel,
        out_shape=jax.ShapeDtypeStruct((B, 1), jnp.float32),
        grid_spec=pltpu.PrefetchScalarGridSpec(
            num_scalar_prefetch=0,
            grid=grid,
            in_specs=in_specs,
            out_specs=out_spec,
            scratch_shapes=scratch,
        ),
        compiler_params=pltpu.CompilerParams(
            dimension_semantics=("parallel", "arbitrary"),
            vmem_limit_bytes=vmem_limit,
        ),
        cost_estimate=cost,
    )(*inputs)

    # Final (tiny) batch mean in plain JAX.
    return jnp.mean(per_row)


# ---------------------------------------------------------------------------
# Self-test
# ---------------------------------------------------------------------------


if __name__ == "__main__":
    key = jax.random.PRNGKey(0)
    keys = jax.random.split(key, 16)

    def _check(out, ref):
        assert jnp.allclose(out, ref, rtol=1e-4, atol=1e-5), (out, ref)

    # Case 1: tiny (B=2, S=8), f32 inputs, bool mask.
    # Exercises ragged-S column masking and OOB row blocks.
    B, S = 2, 8
    lp = -jax.random.uniform(keys[0], (B, S), jnp.float32, 0.1, 2.0)
    olp = -jax.random.uniform(keys[1], (B, S), jnp.float32, 0.1, 2.0)
    adv = jax.random.normal(keys[2], (B, S), jnp.float32)
    mask = jax.random.uniform(keys[3], (B, S)) > 0.3
    mask = mask.at[:, 0].set(True)
    out = jax.block_until_ready(
        policy_loss(lp, olp, adv, mask, clip_eps=0.2, use_pallas=True))
    _check(out, _policy_loss_ref(lp, olp, adv, mask, 0.2))

    # Case 2: bf16 inputs, no mask, multiple ragged S blocks (300 % 128 != 0).
    B2, S2 = 8, 300
    lp2 = (-jax.random.uniform(keys[4], (B2, S2), jnp.float32, 0.1, 2.0)
           ).astype(jnp.bfloat16)
    olp2 = (-jax.random.uniform(keys[5], (B2, S2), jnp.float32, 0.1, 2.0)
            ).astype(jnp.bfloat16)
    adv2 = jax.random.normal(keys[6], (B2, S2), jnp.float32).astype(jnp.bfloat16)
    out2 = jax.block_until_ready(
        policy_loss(lp2, olp2, adv2, None, clip_eps=0.2,
                    block_s=128, use_pallas=True))
    _check(out2, _policy_loss_ref(lp2, olp2, adv2, None, 0.2))

    # Case 3: bf16 inputs + int32 mask (passed through untouched), default
    # tiles: 2 row blocks (v7x megacore path) + ragged rows + ragged S.
    B3, S3 = 80, 1000
    lp3 = (-jax.random.uniform(keys[7], (B3, S3), jnp.float32, 0.1, 2.0)
           ).astype(jnp.bfloat16)
    olp3 = (-jax.random.uniform(keys[8], (B3, S3), jnp.float32, 0.1, 2.0)
            ).astype(jnp.bfloat16)
    adv3 = jax.random.normal(keys[9], (B3, S3), jnp.float32).astype(jnp.bfloat16)
    mask3 = (jax.random.uniform(keys[10], (B3, S3)) > 0.3).astype(jnp.int32)
    mask3 = mask3.at[:, 0].set(1)
    out3 = jax.block_until_ready(
        policy_loss(lp3, olp3, adv3, mask3, clip_eps=0.2, use_pallas=True))
    _check(out3, _policy_loss_ref(lp3, olp3, adv3, mask3, 0.2))

    # Case 4: f32 inputs + fractional f32 mask, explicit small tiles so the
    # multi-step S accumulation (init / accumulate / finalize) is exercised.
    B4, S4 = 48, 640
    lp4 = -jax.random.uniform(keys[11], (B4, S4), jnp.float32, 0.1, 2.0)
    olp4 = -jax.random.uniform(keys[12], (B4, S4), jnp.float32, 0.1, 2.0)
    adv4 = jax.random.normal(keys[13], (B4, S4), jnp.float32)
    mask4 = jax.random.uniform(keys[14], (B4, S4), jnp.float32, 0.05, 1.0)
    out4 = jax.block_until_ready(
        policy_loss(lp4, olp4, adv4, mask4, clip_eps=0.2,
                    block_b=32, block_s=256, use_pallas=True))
    _check(out4, _policy_loss_ref(lp4, olp4, adv4, mask4, 0.2))

    print("KERNEL_OK")
</pallas_src>

<mosaic_0001>
module attributes {stable_mosaic.version = 11 : i64} {
  func.func @_policy_loss_masked_kernel(%arg0: i32, %arg1: i32, %arg2: memref<32x128xf32, #tpu.memory_space<vmem>>, %arg3: memref<32x128xf32, #tpu.memory_space<vmem>>, %arg4: memref<32x128xf32, #tpu.memory_space<vmem>>, %arg5: memref<32x128xi8, #tpu.memory_space<vmem>>, %arg6: memref<32x1xf32, #tpu.memory_space<vmem>>, %arg7: memref<32x128xf32, #tpu.memory_space<vmem>>, %arg8: memref<32x128xf32, #tpu.memory_space<vmem>>) attributes {dimension_semantics = [#tpu.dimension_semantics<parallel>, #tpu.dimension_semantics<arbitrary>], iteration_bounds = array<i64: 1, 1>, scalar_prefetch = 0 : i64, scratch_operands = 2 : i64, tpu.core_type = #tpu.core_type<tc>, window_params = [{transform_indices = @transform_0, window_bounds = array<i64: 32, 128>}, {transform_indices = @transform_1, window_bounds = array<i64: 32, 128>}, {transform_indices = @transform_2, window_bounds = array<i64: 32, 128>}, {transform_indices = @transform_3, window_bounds = array<i64: 32, 128>}, {transform_indices = @transform_4, window_bounds = array<i64: 32, 1>}]} {
    %c0_i32 = arith.constant 0 : i32
    %0 = arith.cmpi eq, %arg1, %c0_i32 : i32
    %1 = arith.extui %0 : i1 to i32
    %c0_i32_0 = arith.constant 0 : i32
    %2 = arith.cmpi ne, %1, %c0_i32_0 : i32
    scf.if %2 {
      %cst_22 = arith.constant 0.000000e+00 : f32
      %43 = vector.broadcast %cst_22 : f32 to vector<32x128xf32>
      %c0_23 = arith.constant 0 : index
      %c0_24 = arith.constant 0 : index
      %44 = vector.load %arg7[%c0_23, %c0_24] : memref<32x128xf32, #tpu.memory_space<vmem>>, vector<32x128xf32>
      tpu.vector_store %arg7[%c0_23, %c0_24], %43 {strides = array<i32>} : memref<32x128xf32, #tpu.memory_space<vmem>>, vector<32x128xf32>,
      %cst_25 = arith.constant 0.000000e+00 : f32
      %45 = vector.broadcast %cst_25 : f32 to vector<32x128xf32>
      %c0_26 = arith.constant 0 : index
      %c0_27 = arith.constant 0 : index
      %46 = vector.load %arg8[%c0_26, %c0_27] : memref<32x128xf32, #tpu.memory_space<vmem>>, vector<32x128xf32>
      tpu.vector_store %arg8[%c0_26, %c0_27], %45 {strides = array<i32>} : memref<32x128xf32, #tpu.memory_space<vmem>>, vector<32x128xf32>,
    } else {
    }
    %c0 = arith.constant 0 : index
    %c0_1 = arith.constant 0 : index
    %3 = vector.load %arg2[%c0, %c0_1] : memref<32x128xf32, #tpu.memory_space<vmem>>, vector<32x128xf32>
    %c0_2 = arith.constant 0 : index
    %c0_3 = arith.constant 0 : index
    %4 = vector.load %arg3[%c0_2, %c0_3] : memref<32x128xf32, #tpu.memory_space<vmem>>, vector<32x128xf32>
    %c0_4 = arith.constant 0 : index
    %c0_5 = arith.constant 0 : index
    %5 = vector.load %arg4[%c0_4, %c0_5] : memref<32x128xf32, #tpu.memory_space<vmem>>, vector<32x128xf32>
    %6 = arith.subf %3, %4 : vector<32x128xf32>
    %7 = math.exp %6 : vector<32x128xf32>
    %8 = arith.mulf %7, %5 : vector<32x128xf32>
    %cst = arith.constant 8.000000e-01 : f32
    %cst_6 = arith.constant 1.200000e+00 : f32
    %9 = vector.broadcast %cst : f32 to vector<32x128xf32>
    %10 = arith.maximumf %9, %7 : vector<32x128xf32>
    %11 = vector.broadcast %cst_6 : f32 to vector<32x128xf32>
    %12 = arith.minimumf %11, %10 : vector<32x128xf32>
    %13 = arith.mulf %12, %5 : vector<32x128xf32>
    %14 = arith.minimumf %8, %13 : vector<32x128xf32>
    %cst_7 = arith.constant 0.000000e+00 : f32
    %15 = vector.broadcast %cst_7 : f32 to vector<32x128xf32>
    %16 = arith.subf %15, %14 : vector<32x128xf32>
    %c0_8 = arith.constant 0 : index
    %c0_9 = arith.constant 0 : index
    %17 = vector.load %arg5[%c0_8, %c0_9] : memref<32x128xi8, #tpu.memory_space<vmem>>, vector<32x128xi8>
    %18 = arith.sitofp %17 : vector<32x128xi8> to vector<32x128xf32>
    %19 = arith.mulf %16, %18 : vector<32x128xf32>
    %20 = tpu.iota {dimensions = array<i32: 1>} : vector<1x128xi32>
    %c128_i32 = arith.constant 128 : i32
    %21 = arith.muli %arg1, %c128_i32 : i32
    %22 = vector.broadcast %21 : i32 to vector<1x128xi32>
    %23 = arith.addi %20, %22 : vector<1x128xi32>
    %c8_i32 = arith.constant 8 : i32
    %24 = vector.broadcast %c8_i32 : i32 to vector<1x128xi32>
    %25 = arith.cmpi slt, %23, %24 : vector<1x128xi32>
    %cst_10 = arith.constant 0.000000e+00 : f32
    %26 = vector.shape_cast %25 : vector<1x128xi1> to vector<1x128xi1>
    %27 = vector.broadcast %26 : vector<1x128xi1> to vector<32x128xi1>
    %28 = vector.broadcast %cst_10 : f32 to vector<32x128xf32>
    %29 = arith.select %27, %19, %28 : vector<32x128xi1>, vector<32x128xf32>
    %cst_11 = arith.constant 0.000000e+00 : f32
    %30 = vector.shape_cast %25 : vector<1x128xi1> to vector<1x128xi1>
    %31 = vector.broadcast %30 : vector<1x128xi1> to vector<32x128xi1>
    %32 = vector.broadcast %cst_11 : f32 to vector<32x128xf32>
    %33 = arith.select %31, %18, %32 : vector<32x128xi1>, vector<32x128xf32>
    %c0_12 = arith.constant 0 : index
    %c0_13 = arith.constant 0 : index
    %34 = vector.load %arg7[%c0_12, %c0_13] : memref<32x128xf32, #tpu.memory_space<vmem>>, vector<32x128xf32>
    %35 = arith.addf %34, %29 : vector<32x128xf32>
    %c0_14 = arith.constant 0 : index
    %c0_15 = arith.constant 0 : index
    %36 = vector.load %arg7[%c0_14, %c0_15] : memref<32x128xf32, #tpu.memory_space<vmem>>, vector<32x128xf32>
    tpu.vector_store %arg7[%c0_14, %c0_15], %35 {strides = array<i32>} : memref<32x128xf32, #tpu.memory_space<vmem>>, vector<32x128xf32>,
    %c0_16 = arith.constant 0 : index
    %c0_17 = arith.constant 0 : index
    %37 = vector.load %arg8[%c0_16, %c0_17] : memref<32x128xf32, #tpu.memory_space<vmem>>, vector<32x128xf32>
    %38 = arith.addf %37, %33 : vector<32x128xf32>
    %c0_18 = arith.constant 0 : index
    %c0_19 = arith.constant 0 : index
    %39 = vector.load %arg8[%c0_18, %c0_19] : memref<32x128xf32, #tpu.memory_space<vmem>>, vector<32x128xf32>
    tpu.vector_store %arg8[%c0_18, %c0_19], %38 {strides = array<i32>} : memref<32x128xf32, #tpu.memory_space<vmem>>, vector<32x128xf32>,
    %c0_i32_20 = arith.constant 0 : i32
    %40 = arith.cmpi eq, %arg1, %c0_i32_20 : i32
    %41 = arith.extui %40 : i1 to i32
    %c0_i32_21 = arith.constant 0 : i32
    %42 = arith.cmpi ne, %41, %c0_i32_21 : i32
    scf.if %42 {
      %c0_22 = arith.constant 0 : index
      %c0_23 = arith.constant 0 : index
      %43 = vector.load %arg7[%c0_22, %c0_23] : memref<32x128xf32, #tpu.memory_space<vmem>>, vector<32x128xf32>
      %cst_24 = arith.constant dense<0.000000e+00> : vector<32xf32>
      %44 = vector.multi_reduction <add>, %43, %cst_24 [1] : vector<32x128xf32> to vector<32xf32>
      %45 = vector.shape_cast %44 : vector<32xf32> to vector<32x1xf32>
      %c0_25 = arith.constant 0 : index
      %c0_26 = arith.constant 0 : index
      %46 = vector.load %arg8[%c0_25, %c0_26] : memref<32x128xf32, #tpu.memory_space<vmem>>, vector<32x128xf32>
      %cst_27 = arith.constant dense<0.000000e+00> : vector<32xf32>
      %47 = vector.multi_reduction <add>, %46, %cst_27 [1] : vector<32x128xf32> to vector<32xf32>
      %48 = vector.shape_cast %47 : vector<32xf32> to vector<32x1xf32>
      %49 = arith.divf %45, %48 : vector<32x1xf32>
      %c0_28 = arith.constant 0 : index
      %c0_29 = arith.constant 0 : index
      %50 = vector.load %arg6[%c0_28, %c0_29] : memref<32x1xf32, #tpu.memory_space<vmem>>, vector<32x1xf32>
      tpu.vector_store %arg6[%c0_28, %c0_29], %49 {strides = array<i32>} : memref<32x1xf32, #tpu.memory_space<vmem>>, vector<32x1xf32>,
    } else {
    }
    return
  }
  func.func @transform_0(%arg0: i32, %arg1: i32) -> (i32, i32) {
    %c0_i32 = arith.constant 0 : i32
    return %arg0, %arg1 : i32, i32
  }
  func.func @transform_1(%arg0: i32, %arg1: i32) -> (i32, i32) {
    %c0_i32 = arith.constant 0 : i32
    return %arg0, %arg1 : i32, i32
  }
  func.func @transform_2(%arg0: i32, %arg1: i32) -> (i32, i32) {
    %c0_i32 = arith.constant 0 : i32
    return %arg0, %arg1 : i32, i32
  }
  func.func @transform_3(%arg0: i32, %arg1: i32) -> (i32, i32) {
    %c0_i32 = arith.constant 0 : i32
    return %arg0, %arg1 : i32, i32
  }
  func.func @transform_4(%arg0: i32, %arg1: i32) -> (i32, i32) {
    %c0_i32 = arith.constant 0 : i32
    %c0_i32_0 = arith.constant 0 : i32
    return %arg0, %c0_i32 : i32, i32
  }
}

</mosaic_0001>

<bundles_post_ra>
// kernel: tpu_custom_call.1
= control target key start
LH: loop header
LB: loop body
LE: loop exit
PB: predicated region body
PF: predicated region fallthrough
CT: control target
= control target key end

     0   :  { %9 = vsyncpa [#allocation5], 0  ;;  %s408_s0 = inlined_call_operand.hbm [shape: f32[2,8], index: 0, kind: input, shape index: {}]   ;;  %s409_s1 = inlined_call_operand.vmem [shape: f32[2,8], index: 1, kind: input, shape index: {}]   ;;  %s410_s2 = inlined_call_operand.vmem [shape: f32[2,8], index: 2, kind: input, shape index: {}]   ;;  %s411_s3 = inlined_call_operand.vmem [shape: s8[2,8], index: 3, kind: input, shape index: {}]   ;;  %s412_s4 = inlined_call_operand.vmem [shape: f32[2,1], index: 4, kind: output, shape index: {}]  }
   0x1   :  { %14 = vsyncadd [#allocation5], 480  ;;  %s298_s15 = smov [#allocation4]   ;;  %s274_s19 = scalar_lea.hbm %s408_s0, 32 }
   0x2   :  { %s15_s16 = sshll.u32 %s298_s15, 4  ;;  %p275_p0 = scmp.ne.s32.totalorder %s408_s0, %s274_s19  ;;  %s16_s16 = int_to_ptr.vmem [resolvable:$true] %s15_s16 }
   0x3   :  { %p278_p1 = scmp.lt.u32.totalorder %s274_s19, %s408_s0 }
   0x5   :  { %p280_p2 = pnand %p278_p1, %p275_p0 }
   0x7   :  { %283 = shalt.err (!%p280_p2)
}
   0x8   :  { %s284_s24 = scalar_lea.vmem %s16_s16, 32  ;;  %s288_s25 = scalar_lea.vmem %s16_s16, 512 }
   0x9   :  { %p285_p3 = scmp.ne.s32.totalorder %s16_s16, %s284_s24  ;;  %p289_p4 = scmp.lt.s32.totalorder %s16_s16, %s16_s16 }
   0xa   :  { %p290_p5 = scmp.lt.s32.totalorder %s288_s25, %s284_s24 }
   0xc   :  { %p291_p6 = por %p290_p5, %p289_p4 }
   0xe   :  { %p292_p7 = pnand %p291_p6, %p285_p3 }
  0x10   :  { %295 = shalt.err (!%p292_p7)
}
  0x11   :  { %s299_s26 = smov 32   ;;  %s300_s27 = smov 2  }
  0x12   :  { %21 = dma.hbm_to_vmem [thread:$0]  %s408_s0, 32, %s16_s16, [#allocation5], %s299_s26, %s299_s26, %s300_s27  }
  0x13   :  { %296 = dma.done.wait [#allocation5], 512  }
  0x14   :  { %297 = vsyncadd [#allocation5], 4294966784  ;;  %v135_v0 = vlaneseq  ;;  %v91_v2 = vld [vmem:[%s411_s3] sm:$0x1]  ;;  %v92_v3 = vld [vmem:[%s411_s3 + $0x1] sm:$0x1] }
  0x15   :  { %v95_v4 = vld [vmem:[%s411_s3 + $0x4] sm:$0x1]  ;;  %v99_v5 = vunpack.c.0.s8 %v91_v2  ;;  %v100_v6 = vunpack.c.0.s8 %v92_v3  ;;  %v96_v7 = vld [vmem:[%s411_s3 + $0x5] sm:$0x1]  ;;  %v93_v9 = vld [vmem:[%s411_s3 + $0x2] sm:$0x1] }
  0x16   :  { %v338_v1 = vand.u32 127, %v135_v0  ;;  %v103_v8 = vunpack.c.0.s8 %v95_v4  ;;  %v94_v10 = vld [vmem:[%s411_s3 + $0x3] sm:$0x1]  ;;  %v104_v11 = vunpack.c.0.s8 %v96_v7  ;;  %v101_v12 = vunpack.c.0.s8 %v93_v9  ;;  %v97_v14 = vld [vmem:[%s411_s3 + $0x6] sm:$0x1]  ;;  %v44_v22 = vld [vmem:[#allocation4 + $0x8] sm:$0xff] }
  0x17   :  { %v102_v13 = vunpack.c.0.s8 %v94_v10  ;;  %v98_v15 = vld [vmem:[%s411_s3 + $0x7] sm:$0x1]  ;;  %v107_v17 = vcvt.s32.f32 %v99_v5  ;;  %v108_v18 = vcvt.s32.f32 %v100_v6  ;;  %v105_v20 = vunpack.c.0.s8 %v97_v14  ;;  %v48_v27 = vld [vmem:[%s409_s1 + $0x8] sm:$0xff]  ;;  %v45_v28 = vld [vmem:[#allocation4 + $0x10] sm:$0xff] }
  0x18   :  { %vm140_vm0 = vcmp.lt.s32.totalorder %v338_v1, 8  ;;  %v43_v16 = vld [vmem:[#allocation4] sm:$0xff]  ;;  %v111_v19 = vcvt.s32.f32 %v103_v8  ;;  %v112_v23 = vcvt.s32.f32 %v104_v11  ;;  %v109_v24 = vcvt.s32.f32 %v101_v12  ;;  %v49_v33 = vld [vmem:[%s409_s1 + $0x10] sm:$0xff]  ;;  %v46_v34 = vld [vmem:[#allocation4 + $0x18] sm:$0xff] }
  0x19   :  { %v47_v21 = vld [vmem:[%s409_s1] sm:$0xff]  ;;  %v110_v25 = vcvt.s32.f32 %v102_v13  ;;  %v106_v26 = vunpack.c.0.s8 %v98_v15  ;;  %v123_v29 = vcombine.low %v107_v17, %v108_v18  ;;  %v113_v30 = vcvt.s32.f32 %v105_v20  ;;  %v50_v39 = vld [vmem:[%s409_s1 + $0x18] sm:$0xff]  ;;  %v52_v54 = vld [vmem:[%s410_s2 + $0x8] sm:$0xff] }
  0x1a   :  { %v55_v31 = vsub.f32 %v43_v16, %v47_v21  ;;  %v56_v32 = vsub.f32 %v44_v22, %v48_v27  ;;  %v125_v35 = vcombine.low %v111_v19, %v112_v23  ;;  %v57_v38 = vsub.f32 %v45_v28, %v49_v33  ;;  %v51_v51 = vld [vmem:[%s410_s2] sm:$0xff]  ;;  %v53_v57 = vld [vmem:[%s410_s2 + $0x10] sm:$0xff]  ;;  %v54_v62 = vld [vmem:[%s410_s2 + $0x18] sm:$0xff] }
  0x1b   :  { %v124_v36 = vcombine.low %v109_v24, %v110_v25  ;;  %v114_v37 = vcvt.s32.f32 %v106_v26  ;;  %v147_v40 = vsel %vm140_vm0, %v123_v29, 0.0  ;;  %v58_v43 = vsub.f32 %v46_v34, %v50_v39 }
  0x1c   :  { %v59_v41 = vmul.f32 1.442695, %v55_v31  ;;  %v61_v42 = vmul.f32 1.442695, %v56_v32  ;;  %194 = vadd.xlane.f32.xlu0 %v147_v40  ;;  %v149_v44 = vsel %vm140_vm0, %v125_v35, 0.0  ;;  %vm210_vm1 = vcmask 7168  }
  0x1d   :  { %v126_v45 = vcombine.low %v113_v30, %v114_v37  ;;  %v63_v46 = vmul.f32 1.442695, %v57_v38  ;;  %198 = vadd.xlane.f32.xlu1 %v149_v44  ;;  %v148_v47 = vsel %vm140_vm0, %v124_v36, 0.0  ;;  %v65_v48 = vmul.f32 1.442695, %v58_v43 }
  0x1e   :  { %258 = vpow2.f32 %v59_v41 }
  0x1f   :  { %v150_v49 = vsel %vm140_vm0, %v126_v45, 0.0  ;;  %260 = vpow2.f32 %v61_v42 }
  0x20   :  { %262 = vpow2.f32 %v63_v46  ;;  %196 = vadd.xlane.f32.xlu0 %v148_v47 }
  0x21   :  { %264 = vpow2.f32 %v65_v48  ;;  %200 = vadd.xlane.f32.xlu1 %v150_v49 }
  0x28   :  { %v259_v50 = vpop.eup %258 }
  0x29   :  { %v261_v52 = vpop.eup %260  ;;  %v71_v53 = vmax.f32 %v259_v50, 0.8  ;;  %v67_v59 = vmul.f32 %v259_v50, %v51_v51 }
  0x2a   :  { %v263_v55 = vpop.eup %262  ;;  %v72_v56 = vmax.f32 %v261_v52, 0.8  ;;  %v68_v63 = vmul.f32 %v261_v52, %v52_v54 }
  0x2b   :  { %v265_v58 = vpop.eup %264  ;;  %v75_v60 = vmin.f32 %v71_v53, 1.2  ;;  %v73_v61 = vmax.f32 %v263_v55, 0.8  ;;  %v69_v4 = vmul.f32 %v263_v55, %v53_v57 }
  0x2c   :  { %v76_v0 = vmin.f32 %v72_v56, 1.2  ;;  %v74_v2 = vmax.f32 %v265_v58, 0.8  ;;  %v70_v7 = vmul.f32 %v265_v58, %v54_v62 }
  0x2d   :  { %v79_v3 = vmul.f32 %v75_v60, %v51_v51  ;;  %v77_v5 = vmin.f32 %v73_v61, 1.2 }
  0x2e   :  { %v80_v6 = vmul.f32 %v76_v0, %v52_v54  ;;  %v78_v8 = vmin.f32 %v74_v2, 1.2 }
  0x2f   :  { %v83_v9 = vmin.f32 %v67_v59, %v79_v3  ;;  %v81_v10 = vmul.f32 %v77_v5, %v53_v57 }
  0x30   :  { %v84_v11 = vmin.f32 %v68_v63, %v80_v6  ;;  %v82_v12 = vmul.f32 %v78_v8, %v54_v62 }
  0x31   :  { %v87_v13 = vsub.f32 0.0, %v83_v9  ;;  %v85_v14 = vmin.f32 %v69_v4, %v81_v10 }
  0x32   :  { %v88_v15 = vsub.f32 0.0, %v84_v11  ;;  %v86_v16 = vmin.f32 %v70_v7, %v82_v12 }
  0x33   :  { %v131_v17 = vmul.f32 %v123_v29, %v87_v13  ;;  %v89_v18 = vsub.f32 0.0, %v85_v14 }
  0x34   :  { %v132_v19 = vmul.f32 %v124_v36, %v88_v15  ;;  %v90_v20 = vsub.f32 0.0, %v86_v16 }
  0x35   :  { %v143_v21 = vsel %vm140_vm0, %v131_v17, 0.0  ;;  %v133_v22 = vmul.f32 %v125_v35, %v89_v18 }
  0x36   :  { %182 = vadd.xlane.f32.xlu0 %v143_v21  ;;  %v144_v23 = vsel %vm140_vm0, %v132_v19, 0.0  ;;  %v134_v24 = vmul.f32 %v126_v45, %v90_v20 }
  0x37   :  { %184 = vadd.xlane.f32.xlu1 %v144_v23  ;;  %v145_v25 = vsel %vm140_vm0, %v133_v22, 0.0 }
  0x38   :  { %v146_v26 = vsel %vm140_vm0, %v134_v24, 0.0 }
  0x3a   :  { %186 = vadd.xlane.f32.xlu0 %v145_v25 }
  0x3b   :  { %188 = vadd.xlane.f32.xlu1 %v146_v26 }
  0xa9   :  { %v195_v27 = vpop.xlane.xlu0 %194 }
  0xaa   :  { %v199_v28 = vpop.xlane.xlu1 %198  ;;  %266 = vrcp.f32 %v195_v27 }
  0xad   :  { %v197_v29 = vpop.xlane.xlu0 %196 }
  0xae   :  { %268 = vrcp.f32 %v197_v29  ;;  %v201_v30 = vpop.xlane.xlu1 %200 }
  0xaf   :  { %270 = vrcp.f32 %v199_v28 }
  0xb0   :  { %272 = vrcp.f32 %v201_v30 }
  0xb4   :  { %v267_v31 = vpop.eup %266 }
  0xb8   :  { %v269_v32 = vpop.eup %268 }
  0xb9   :  { %v271_v36 = vpop.eup %270 }
  0xba   :  { %v273_v37 = vpop.eup %272 }
  0xc3   :  { %v183_v33 = vpop.xlane.xlu0 %182 }
  0xc4   :  { %v203_v34 = vmul.f32 %v267_v31, %v183_v33  ;;  %v185_v35 = vpop.xlane.xlu1 %184 }
  0xc6   :  { %211 = vst.msk [vmem:[#allocation6] sm:$0xff] %vm210_vm1, %v203_v34 }
  0xc7   :  { %v187_v1 = vpop.xlane.xlu0 %186 }
  0xc8   :  { %v189_v38 = vpop.xlane.xlu1 %188 }
  0xcd   :  { %v232_v39 = vld [vmem:[#allocation6] sm:$0x3] }
  0xce   :  { %233 = vst [vmem:[%s412_s4] sm:$0x3] %v232_v39 }
  0xcf   :  { %250 = vsyncpa [#allocation5], 1 }

</bundles_post_ra>
